<compile_context>
chip_gen: v6e
topology: v6e:2x2x1
jax: 0.10.0
libtpu: 0.0.40
codegen_flags: <defaults>
</compile_context>

<pallas_src>
import functools

import jax
import jax.numpy as jnp
from jax.experimental import pallas as pl
from jax.experimental.pallas import tpu as pltpu

_BN_EPS = 1e-5
_LANE = 128


# ----------------------------------------------------------------------------
# Fused kernel: all Residual blocks + final Linear in one pallas_call
# ----------------------------------------------------------------------------
def _full_spec(shape):
    # Single grid point (grid=()), whole array as one block in VMEM.
    return pl.BlockSpec(shape, lambda: (0,) * len(shape))


def _make_generator_kernel(n_residual):
    """Build a fused kernel for `n_residual` Residual blocks + final Linear.

    Ref order: x, (w, b, gamma, beta) * n_residual, final_w, final_b, o_ref
    All weights are pre-transposed to (in_features, out_features); bias /
    gamma / beta are (1, out_features).
    """

    def kernel(*refs):
        x_ref = refs[0]
        o_ref = refs[-1]

        # Segments of the (virtual) concatenated activation, newest first:
        # after k residual layers the activation is [out_k, ..., out_1, x].
        segs = [x_ref[...]]

        def seg_matmul(w_ref):
            # h_concat @ W  ==  sum_i seg_i @ W[row_i : row_i + d_i, :]
            acc = None
            row = 0
            for s in segs:
                d = s.shape[1]
                part = jnp.dot(
                    s, w_ref[row:row + d, :], preferred_element_type=jnp.float32
                )
                acc = part if acc is None else acc + part
                row += d
            return acc

        idx = 1
        for _ in range(n_residual):
            w_ref, b_ref, g_ref, be_ref = refs[idx:idx + 4]
            idx += 4
            lin = seg_matmul(w_ref) + b_ref[...]
            # BatchNorm1d, training-mode batch statistics (biased variance).
            mean = jnp.mean(lin, axis=0, keepdims=True)
            cen = lin - mean
            var = jnp.mean(cen * cen, axis=0, keepdims=True)
            out = g_ref[...] * (cen * jax.lax.rsqrt(var + _BN_EPS)) + be_ref[...]
            # ReLU + residual "concat" (prepend new segment, never materialized).
            segs.insert(0, jnp.maximum(out, 0.0))

        wf_ref, bf_ref = refs[idx], refs[idx + 1]
        o_ref[...] = seg_matmul(wf_ref) + bf_ref[...]

    return kernel


# ----------------------------------------------------------------------------
# Parameter init (PyTorch-Linear-like), pre-transposed / pre-shaped / lane-padded
# ----------------------------------------------------------------------------
def init_generator_params(key, embedding_dim, generator_dim, data_dim):
    params = {"residuals": []}
    dim = embedding_dim
    for item in generator_dim:
        key, kw, kb = jax.random.split(key, 3)
        bound = 1.0 / float(dim) ** 0.5
        w = jax.random.uniform(kw, (item, dim), jnp.float32, -bound, bound)
        b = jax.random.uniform(kb, (item,), jnp.float32, -bound, bound)
        params["residuals"].append(
            {
                "w": w.T,                                   # (dim, item)
                "b": b.reshape(1, item),
                "gamma": jnp.ones((1, item), jnp.float32),
                "beta": jnp.zeros((1, item), jnp.float32),
            }
        )
        dim += item

    key, kw, kb = jax.random.split(key, 3)
    bound = 1.0 / float(dim) ** 0.5
    wf = jax.random.uniform(kw, (data_dim, dim), jnp.float32, -bound, bound)
    bf = jax.random.uniform(kb, (data_dim,), jnp.float32, -bound, bound)

    # Lane-pad the output dimension to a multiple of 128 with zero columns so
    # the kernel's only HBM store is lane-dense (unmasked vst).
    data_dim_pad = -(-data_dim // _LANE) * _LANE
    wf_pad = jnp.zeros((dim, data_dim_pad), jnp.float32).at[:, :data_dim].set(wf.T)
    bf_pad = jnp.zeros((1, data_dim_pad), jnp.float32).at[:, :data_dim].set(bf)
    params["final_w"] = wf_pad
    params["final_b"] = bf_pad
    return params


# ----------------------------------------------------------------------------
# Forward: one jit, one pallas_call
# ----------------------------------------------------------------------------
@functools.partial(jax.jit, static_argnames=("data_dim",))
def generator_forward(params, x, *, data_dim):
    residuals = params["residuals"]
    args = [x]
    for p in residuals:
        args += [p["w"], p["b"], p["gamma"], p["beta"]]
    args += [params["final_w"], params["final_b"]]

    batch = x.shape[0]
    out_pad = params["final_b"].shape[1]

    out = pl.pallas_call(
        _make_generator_kernel(len(residuals)),
        out_shape=jax.ShapeDtypeStruct((batch, out_pad), jnp.float32),
        grid=(),
        in_specs=[_full_spec(a.shape) for a in args],
        out_specs=_full_spec((batch, out_pad)),
        compiler_params=pltpu.CompilerParams(vmem_limit_bytes=32 * 1024 * 1024),
    )(*args)
    return out[:, :data_dim]


# ----------------------------------------------------------------------------
# Pure-JAX reference (matches the PyTorch module math)
# ----------------------------------------------------------------------------
def generator_reference(params, x, data_dim):
    h = x
    for p in params["residuals"]:
        lin = h @ p["w"] + p["b"]
        mean = jnp.mean(lin, axis=0, keepdims=True)
        var = jnp.mean((lin - mean) ** 2, axis=0, keepdims=True)
        out = p["gamma"] * (lin - mean) * jax.lax.rsqrt(var + _BN_EPS) + p["beta"]
        h = jnp.concatenate([jnp.maximum(out, 0.0), h], axis=1)
    y = h @ params["final_w"] + params["final_b"]
    return y[:, :data_dim]


# ----------------------------------------------------------------------------
# Main
# ----------------------------------------------------------------------------
if __name__ == "__main__":
    embedding_dim = 32
    generator_dim = (32, 32)
    data_dim = 16
    batch = 8

    key = jax.random.PRNGKey(0)
    key_params, key_x = jax.random.split(key)

    params = init_generator_params(key_params, embedding_dim, generator_dim, data_dim)
    x = jax.random.normal(key_x, (batch, embedding_dim), jnp.float32)

    out = generator_forward(params, x, data_dim=data_dim)
    out = jax.block_until_ready(out)

    assert out.shape == (batch, data_dim), out.shape
    assert out.dtype == jnp.float32

    ref = generator_reference(params, x, data_dim)
    max_err = float(jnp.max(jnp.abs(out - ref)))
    assert jnp.allclose(out, ref, rtol=1e-3, atol=1e-3), max_err

    print("KERNEL_OK")
</pallas_src>

<mosaic_0001>
module attributes {stable_mosaic.version = 11 : i64} {
  func.func @kernel(%arg0: memref<8x32xf32, #tpu.memory_space<vmem>>, %arg1: memref<32x32xf32, #tpu.memory_space<vmem>>, %arg2: memref<1x32xf32, #tpu.memory_space<vmem>>, %arg3: memref<1x32xf32, #tpu.memory_space<vmem>>, %arg4: memref<1x32xf32, #tpu.memory_space<vmem>>, %arg5: memref<64x32xf32, #tpu.memory_space<vmem>>, %arg6: memref<1x32xf32, #tpu.memory_space<vmem>>, %arg7: memref<1x32xf32, #tpu.memory_space<vmem>>, %arg8: memref<1x32xf32, #tpu.memory_space<vmem>>, %arg9: memref<96x128xf32, #tpu.memory_space<vmem>>, %arg10: memref<1x128xf32, #tpu.memory_space<vmem>>, %arg11: memref<8x128xf32, #tpu.memory_space<vmem>>) attributes {dimension_semantics = [], scalar_prefetch = 0 : i64, scratch_operands = 0 : i64, tpu.core_type = #tpu.core_type<tc>} {
    %c0 = arith.constant 0 : index
    %c0_0 = arith.constant 0 : index
    %0 = vector.load %arg0[%c0, %c0_0] : memref<8x32xf32, #tpu.memory_space<vmem>>, vector<8x32xf32>
    %c0_1 = arith.constant 0 : index
    %c0_2 = arith.constant 0 : index
    %1 = vector.load %arg1[%c0_1, %c0_2] : memref<32x32xf32, #tpu.memory_space<vmem>>, vector<32x32xf32>
    %cst = arith.constant dense<0.000000e+00> : vector<8x32xf32>
    %2 = tpu.matmul %0, %1, %cst {dimension_numbers = #tpu.dot_dimension_numbers<[1], [0], [0], [1], [0, 0, 1, 1], [], []>} : vector<8x32xf32>, vector<32x32xf32>, vector<8x32xf32> -> vector<8x32xf32>
    %c0_3 = arith.constant 0 : index
    %c0_4 = arith.constant 0 : index
    %3 = vector.load %arg2[%c0_3, %c0_4] : memref<1x32xf32, #tpu.memory_space<vmem>>, vector<1x32xf32>
    %4 = vector.broadcast %3 : vector<1x32xf32> to vector<8x32xf32>
    %5 = arith.addf %2, %4 : vector<8x32xf32>
    %cst_5 = arith.constant dense<0.000000e+00> : vector<32xf32>
    %6 = vector.multi_reduction <add>, %5, %cst_5 [0] : vector<8x32xf32> to vector<32xf32>
    %7 = vector.shape_cast %6 : vector<32xf32> to vector<1x32xf32>
    %cst_6 = arith.constant 8.000000e+00 : f32
    %8 = vector.broadcast %cst_6 : f32 to vector<1x32xf32>
    %9 = arith.divf %7, %8 : vector<1x32xf32>
    %10 = vector.broadcast %9 : vector<1x32xf32> to vector<8x32xf32>
    %11 = arith.subf %5, %10 : vector<8x32xf32>
    %12 = arith.mulf %11, %11 : vector<8x32xf32>
    %cst_7 = arith.constant dense<0.000000e+00> : vector<32xf32>
    %13 = vector.multi_reduction <add>, %12, %cst_7 [0] : vector<8x32xf32> to vector<32xf32>
    %14 = vector.shape_cast %13 : vector<32xf32> to vector<1x32xf32>
    %cst_8 = arith.constant 8.000000e+00 : f32
    %15 = vector.broadcast %cst_8 : f32 to vector<1x32xf32>
    %16 = arith.divf %14, %15 : vector<1x32xf32>
    %c0_9 = arith.constant 0 : index
    %c0_10 = arith.constant 0 : index
    %17 = vector.load %arg3[%c0_9, %c0_10] : memref<1x32xf32, #tpu.memory_space<vmem>>, vector<1x32xf32>
    %cst_11 = arith.constant 9.99999974E-6 : f32
    %18 = vector.broadcast %cst_11 : f32 to vector<1x32xf32>
    %19 = arith.addf %16, %18 : vector<1x32xf32>
    %20 = math.rsqrt %19 : vector<1x32xf32>
    %21 = vector.broadcast %20 : vector<1x32xf32> to vector<8x32xf32>
    %22 = arith.mulf %11, %21 : vector<8x32xf32>
    %23 = vector.broadcast %17 : vector<1x32xf32> to vector<8x32xf32>
    %24 = arith.mulf %23, %22 : vector<8x32xf32>
    %c0_12 = arith.constant 0 : index
    %c0_13 = arith.constant 0 : index
    %25 = vector.load %arg4[%c0_12, %c0_13] : memref<1x32xf32, #tpu.memory_space<vmem>>, vector<1x32xf32>
    %26 = vector.broadcast %25 : vector<1x32xf32> to vector<8x32xf32>
    %27 = arith.addf %24, %26 : vector<8x32xf32>
    %cst_14 = arith.constant 0.000000e+00 : f32
    %28 = vector.broadcast %cst_14 : f32 to vector<8x32xf32>
    %29 = arith.maximumf %27, %28 : vector<8x32xf32>
    %c0_15 = arith.constant 0 : index
    %c0_16 = arith.constant 0 : index
    %30 = vector.load %arg5[%c0_15, %c0_16] : memref<64x32xf32, #tpu.memory_space<vmem>>, vector<32x32xf32>
    %cst_17 = arith.constant dense<0.000000e+00> : vector<8x32xf32>
    %31 = tpu.matmul %29, %30, %cst_17 {dimension_numbers = #tpu.dot_dimension_numbers<[1], [0], [0], [1], [0, 0, 1, 1], [], []>} : vector<8x32xf32>, vector<32x32xf32>, vector<8x32xf32> -> vector<8x32xf32>
    %c32 = arith.constant 32 : index
    %c0_18 = arith.constant 0 : index
    %32 = vector.load %arg5[%c32, %c0_18] : memref<64x32xf32, #tpu.memory_space<vmem>>, vector<32x32xf32>
    %cst_19 = arith.constant dense<0.000000e+00> : vector<8x32xf32>
    %33 = tpu.matmul %0, %32, %cst_19 {dimension_numbers = #tpu.dot_dimension_numbers<[1], [0], [0], [1], [0, 0, 1, 1], [], []>} : vector<8x32xf32>, vector<32x32xf32>, vector<8x32xf32> -> vector<8x32xf32>
    %34 = arith.addf %31, %33 : vector<8x32xf32>
    %c0_20 = arith.constant 0 : index
    %c0_21 = arith.constant 0 : index
    %35 = vector.load %arg6[%c0_20, %c0_21] : memref<1x32xf32, #tpu.memory_space<vmem>>, vector<1x32xf32>
    %36 = vector.broadcast %35 : vector<1x32xf32> to vector<8x32xf32>
    %37 = arith.addf %34, %36 : vector<8x32xf32>
    %cst_22 = arith.constant dense<0.000000e+00> : vector<32xf32>
    %38 = vector.multi_reduction <add>, %37, %cst_22 [0] : vector<8x32xf32> to vector<32xf32>
    %39 = vector.shape_cast %38 : vector<32xf32> to vector<1x32xf32>
    %cst_23 = arith.constant 8.000000e+00 : f32
    %40 = vector.broadcast %cst_23 : f32 to vector<1x32xf32>
    %41 = arith.divf %39, %40 : vector<1x32xf32>
    %42 = vector.broadcast %41 : vector<1x32xf32> to vector<8x32xf32>
    %43 = arith.subf %37, %42 : vector<8x32xf32>
    %44 = arith.mulf %43, %43 : vector<8x32xf32>
    %cst_24 = arith.constant dense<0.000000e+00> : vector<32xf32>
    %45 = vector.multi_reduction <add>, %44, %cst_24 [0] : vector<8x32xf32> to vector<32xf32>
    %46 = vector.shape_cast %45 : vector<32xf32> to vector<1x32xf32>
    %cst_25 = arith.constant 8.000000e+00 : f32
    %47 = vector.broadcast %cst_25 : f32 to vector<1x32xf32>
    %48 = arith.divf %46, %47 : vector<1x32xf32>
    %c0_26 = arith.constant 0 : index
    %c0_27 = arith.constant 0 : index
    %49 = vector.load %arg7[%c0_26, %c0_27] : memref<1x32xf32, #tpu.memory_space<vmem>>, vector<1x32xf32>
    %cst_28 = arith.constant 9.99999974E-6 : f32
    %50 = vector.broadcast %cst_28 : f32 to vector<1x32xf32>
    %51 = arith.addf %48, %50 : vector<1x32xf32>
    %52 = math.rsqrt %51 : vector<1x32xf32>
    %53 = vector.broadcast %52 : vector<1x32xf32> to vector<8x32xf32>
    %54 = arith.mulf %43, %53 : vector<8x32xf32>
    %55 = vector.broadcast %49 : vector<1x32xf32> to vector<8x32xf32>
    %56 = arith.mulf %55, %54 : vector<8x32xf32>
    %c0_29 = arith.constant 0 : index
    %c0_30 = arith.constant 0 : index
    %57 = vector.load %arg8[%c0_29, %c0_30] : memref<1x32xf32, #tpu.memory_space<vmem>>, vector<1x32xf32>
    %58 = vector.broadcast %57 : vector<1x32xf32> to vector<8x32xf32>
    %59 = arith.addf %56, %58 : vector<8x32xf32>
    %cst_31 = arith.constant 0.000000e+00 : f32
    %60 = vector.broadcast %cst_31 : f32 to vector<8x32xf32>
    %61 = arith.maximumf %59, %60 : vector<8x32xf32>
    %c0_32 = arith.constant 0 : index
    %c0_33 = arith.constant 0 : index
    %62 = vector.load %arg9[%c0_32, %c0_33] : memref<96x128xf32, #tpu.memory_space<vmem>>, vector<32x128xf32>
    %cst_34 = arith.constant dense<0.000000e+00> : vector<8x128xf32>
    %63 = tpu.matmul %61, %62, %cst_34 {dimension_numbers = #tpu.dot_dimension_numbers<[1], [0], [0], [1], [0, 0, 1, 1], [], []>} : vector<8x32xf32>, vector<32x128xf32>, vector<8x128xf32> -> vector<8x128xf32>
    %c32_35 = arith.constant 32 : index
    %c0_36 = arith.constant 0 : index
    %64 = vector.load %arg9[%c32_35, %c0_36] : memref<96x128xf32, #tpu.memory_space<vmem>>, vector<32x128xf32>
    %cst_37 = arith.constant dense<0.000000e+00> : vector<8x128xf32>
    %65 = tpu.matmul %29, %64, %cst_37 {dimension_numbers = #tpu.dot_dimension_numbers<[1], [0], [0], [1], [0, 0, 1, 1], [], []>} : vector<8x32xf32>, vector<32x128xf32>, vector<8x128xf32> -> vector<8x128xf32>
    %66 = arith.addf %63, %65 : vector<8x128xf32>
    %c64 = arith.constant 64 : index
    %c0_38 = arith.constant 0 : index
    %67 = vector.load %arg9[%c64, %c0_38] : memref<96x128xf32, #tpu.memory_space<vmem>>, vector<32x128xf32>
    %cst_39 = arith.constant dense<0.000000e+00> : vector<8x128xf32>
    %68 = tpu.matmul %0, %67, %cst_39 {dimension_numbers = #tpu.dot_dimension_numbers<[1], [0], [0], [1], [0, 0, 1, 1], [], []>} : vector<8x32xf32>, vector<32x128xf32>, vector<8x128xf32> -> vector<8x128xf32>
    %69 = arith.addf %66, %68 : vector<8x128xf32>
    %c0_40 = arith.constant 0 : index
    %c0_41 = arith.constant 0 : index
    %70 = vector.load %arg10[%c0_40, %c0_41] : memref<1x128xf32, #tpu.memory_space<vmem>>, vector<1x128xf32>
    %71 = vector.broadcast %70 : vector<1x128xf32> to vector<8x128xf32>
    %72 = arith.addf %69, %71 : vector<8x128xf32>
    %c0_42 = arith.constant 0 : index
    %c0_43 = arith.constant 0 : index
    %73 = vector.load %arg11[%c0_42, %c0_43] : memref<8x128xf32, #tpu.memory_space<vmem>>, vector<8x128xf32>
    tpu.vector_store %arg11[%c0_42, %c0_43], %72 {strides = array<i32>} : memref<8x128xf32, #tpu.memory_space<vmem>>, vector<8x128xf32>,
    return
  }
}

</mosaic_0001>

<bundles_post_ra>
// kernel: generator_forward.1
= control target key start
LH: loop header
LB: loop body
LE: loop exit
PB: predicated region body
PF: predicated region fallthrough
CT: control target
= control target key end

     0   :  { %16 = vsyncpa [#allocation3], 0  ;;  %s1102_s0 = inlined_call_operand.vmem [shape: f32[8,32], index: 0, kind: input, shape index: {}]   ;;  %s1103_s1 = inlined_call_operand.hbm [shape: f32[32,32], index: 1, kind: input, shape index: {}]   ;;  %s1104_s2 = inlined_call_operand.vmem [shape: f32[1,32], index: 2, kind: input, shape index: {}]   ;;  %s1105_s3 = inlined_call_operand.hbm [shape: f32[1,32], index: 3, kind: input, shape index: {}]   ;;  %s1106_s4 = inlined_call_operand.hbm [shape: f32[1,32], index: 4, kind: input, shape index: {}]   ;;  %s1107_s5 = inlined_call_operand.vmem [shape: f32[64,32], index: 5, kind: input, shape index: {}]   ;;  %s1108_s6 = inlined_call_operand.vmem [shape: f32[1,32], index: 6, kind: input, shape index: {}]   ;;  %s1109_s7 = inlined_call_operand.vmem [shape: f32[1,32], index: 7, kind: input, shape index: {}]   ;;  %s1110_s8 = inlined_call_operand.vmem [shape: f32[1,32], index: 8, kind: input, shape index: {}]   ;;  %s1111_s9 = inlined_call_operand.vmem [shape: f32[96,128], index: 9, kind: input, shape index: {}]   ;;  %s1112_s10 = inlined_call_operand.hbm [shape: f32[1,128], index: 10, kind: input, shape index: {}]   ;;  %s1113_s11 = inlined_call_operand.hbm [shape: f32[8,128], index: 11, kind: output, shape index: {}]  }
   0x1   :  { %17 = vsyncpa [#allocation6], 0 }
   0x2   :  { %18 = vsyncpa [#allocation9], 0 }
   0x3   :  { %19 = vsyncpa [#allocation4], 0  ;;  %s892_s17 = smov [#allocation5]   ;;  %s893_s19 = smov [#allocation2]  }
   0x4   :  { %s42_s18 = sshll.u32 %s892_s17, 4  ;;  %s27_s20 = sshll.u32 %s893_s19, 4  ;;  %s43_s18 = int_to_ptr.vmem [resolvable:$true] %s42_s18  ;;  %s28_s20 = int_to_ptr.vmem [resolvable:$true] %s27_s20 }
   0x5   :  { %s792_s21 = scalar_lea.vmem %s43_s18, 16  ;;  %s796_s22 = scalar_lea.vmem %s43_s18, 32 }
   0x6   :  { %p793_p0 = scmp.ne.s32.totalorder %s43_s18, %s792_s21  ;;  %p797_p1 = scmp.lt.s32.totalorder %s43_s18, %s43_s18 }
   0x7   :  { %p798_p2 = scmp.lt.s32.totalorder %s796_s22, %s792_s21 }
   0x9   :  { %p799_p3 = por %p798_p2, %p797_p1 }
   0xb   :  { %p800_p4 = pnand %p799_p3, %p793_p0 }
   0xd   :  { %803 = shalt.err (!%p800_p4)
}
   0xe   :  { %45 = dma.hbm_to_vmem [thread:$0]  %s1105_s3, 16, %s43_s18, [#allocation6]  }
   0xf   :  { %s812_s25 = scalar_lea.vmem %s28_s20, 512  ;;  %p817_p6 = scmp.lt.s32.totalorder %s28_s20, %s28_s20 }
  0x10   :  { %p813_p5 = scmp.ne.s32.totalorder %s28_s20, %s812_s25  ;;  %p818_p7 = scmp.lt.s32.totalorder %s812_s25, %s812_s25 }
  0x12   :  { %p819_p8 = por %p818_p7, %p817_p6 }
  0x14   :  { %p820_p9 = pnand %p819_p8, %p813_p5 }
  0x16   :  { %823 = shalt.err (!%p820_p9)
}
  0x17   :  { %s894_s26 = smov 128   ;;  %s895_s27 = smov 8  }
  0x18   :  { %33 = dma.hbm_to_vmem [thread:$0]  %s1103_s1, 512, %s28_s20, [#allocation3], %s894_s26, %s894_s26, %s895_s27  }
  0x19   :  { %s896_s30 = smov [#allocation7]   ;;  %s897_s13 = smov [#allocation8]  }
  0x1a   :  { %s52_s12 = sshll.u32 %s896_s30, 4  ;;  %s72_s14 = sshll.u32 %s897_s13, 4  ;;  %s53_s12 = int_to_ptr.vmem [resolvable:$true] %s52_s12  ;;  %s73_s14 = int_to_ptr.vmem [resolvable:$true] %s72_s14 }
  0x1b   :  { %s832_s3 = scalar_lea.vmem %s53_s12, 16  ;;  %s836_s15 = scalar_lea.vmem %s53_s12, 32 }
  0x1c   :  { %p833_p10 = scmp.ne.s32.totalorder %s53_s12, %s832_s3  ;;  %p837_p11 = scmp.lt.s32.totalorder %s53_s12, %s53_s12 }
  0x1d   :  { %p838_p12 = scmp.lt.s32.totalorder %s836_s15, %s832_s3 }
  0x1f   :  { %p839_p13 = por %p838_p12, %p837_p11 }
  0x21   :  { %p840_p0 = pnand %p839_p13, %p833_p10 }
  0x23   :  { %843 = shalt.err (!%p840_p0)
}
  0x24   :  { %55 = dma.hbm_to_vmem [thread:$0]  %s1106_s4, 16, %s53_s12, [#allocation6]  }
  0x25   :  { %s852_s18 = scalar_lea.vmem %s73_s14, 16  ;;  %s856_s1 = scalar_lea.vmem %s73_s14, 32 }
  0x26   :  { %p853_p1 = scmp.ne.s32.totalorder %s73_s14, %s852_s18  ;;  %p857_p2 = scmp.lt.s32.totalorder %s73_s14, %s73_s14 }
  0x27   :  { %p858_p3 = scmp.lt.s32.totalorder %s856_s1, %s852_s18 }
  0x29   :  { %p859_p4 = por %p858_p3, %p857_p2 }
  0x2b   :  { %p860_p5 = pnand %p859_p4, %p853_p1 }
  0x2d   :  { %863 = shalt.err (!%p860_p5)
}
  0x2e   :  { %75 = dma.hbm_to_vmem [thread:$0]  %s1112_s10, 16, %s73_s14, [#allocation9]  }
  0x2f   :  { %884 = dma.done.wait [#allocation3], 512  }
  0x30   :  { %885 = vsyncadd [#allocation3], 4294966784 }
  0x31   :  { %886 = dma.done.wait [#allocation6], 32  }
  0x32   :  { %887 = vsyncadd [#allocation6], 4294967264 }
  0x33   :  { %888 = dma.done.wait [#allocation9], 16  }
  0x34   :  { %889 = vsyncadd [#allocation9], 4294967280  ;;  %v898_v0 = vmov 0.0   ;;  %vm899_vm0 = vmmov 0   ;;  %v92_v1 = vld [vmem:[#allocation2 + $0x18] sm:$0xff]  ;;  %v91_v2 = vld [vmem:[#allocation2 + $0x10] sm:$0xff] }
  0x35   :  { %705 = vmatprep.subr.mxu0 %v898_v0  ;;  %713 = vmatprep.mubr.msk.f32.mxu0 %vm899_vm0, %v898_v0  ;;  %v90_v3 = vld [vmem:[#allocation2 + $0x8] sm:$0xff]  ;;  %v89_v4 = vld [vmem:[#allocation2] sm:$0xff]  ;;  %vm100_vm1 = vcmask 261120   ;;  %v220_v6 = vld [vmem:[%s1107_s5 + $0x38] sm:$0xff]  ;;  %s900_s19 = smov [#allocation10]  }
  0x36   :  { %716 = vmatprep.subr.mxu1 %v898_v0  ;;  %724 = vmatprep.mubr.msk.f32.mxu1 %vm899_vm0, %v898_v0  ;;  %v984_v5 = vld [vmem:[%s1102_s0] sm:$0xff]  ;;  %v219_v7 = vld [vmem:[%s1107_s5 + $0x30] sm:$0xff]  ;;  %v218_v8 = vld [vmem:[%s1107_s5 + $0x28] sm:$0xff]  ;;  %s651_s20 = sshll.u32 %s900_s19, 4  ;;  %s652_s20 = int_to_ptr.vmem [resolvable:$true] %s651_s20 }
  0x37   :  { %706 = vmatpush3.msra.mxu0 %v92_v1  ;;  %717 = vmatpush3.msra.mxu1 %v220_v6  ;;  %v217_v9 = vld [vmem:[%s1107_s5 + $0x20] sm:$0xff]  ;;  %v216_v10 = vld [vmem:[%s1107_s5 + $0x18] sm:$0xff]  ;;  %v215_v12 = vld [vmem:[%s1107_s5 + $0x10] sm:$0xff]  ;;  %p869_p7 = scmp.lt.s32.totalorder %s652_s20, %s652_s20 }
  0x38   :  { %707 = vmatprep.subr.mxu0 %v898_v0  ;;  %718 = vmatprep.subr.mxu1 %v898_v0  ;;  %v417_v11 = vld [vmem:[%s1111_s9 + $0x38] sm:$0xff]  ;;  %v416_v13 = vld [vmem:[%s1111_s9 + $0x30] sm:$0xff]  ;;  %v214_v14 = vld [vmem:[%s1107_s5 + $0x8] sm:$0xff] }
  0x39   :  { %708 = vmatpush3.msra.mxu0 %v91_v2  ;;  %719 = vmatpush3.msra.mxu1 %v219_v7  ;;  %v415_v15 = vld [vmem:[%s1111_s9 + $0x28] sm:$0xff]  ;;  %v213_v16 = vld [vmem:[%s1107_s5] sm:$0xff]  ;;  %v413_v50 = vld [vmem:[%s1111_s9 + $0x18] sm:$0xff] }
  0x3a   :  { %709 = vmatprep.subr.mxu0 %v898_v0  ;;  %720 = vmatprep.subr.mxu1 %v898_v0  ;;  %v414_v17 = vld [vmem:[%s1111_s9 + $0x20] sm:$0xff]  ;;  %v564_v51 = vld [vmem:[%s1111_s9 + $0x58] sm:$0xff]  ;;  %v412_v52 = vld [vmem:[%s1111_s9 + $0x10] sm:$0xff] }
  0x3b   :  { %710 = vmatpush3.msra.mxu0 %v90_v3  ;;  %721 = vmatpush3.msra.mxu1 %v218_v8  ;;  %v662_v18 = vld [vmem:[%s1104_s2] ss:$0 sm:$0xff]  ;;  %v665_v44 = vld [vmem:[#allocation7] ss:$0 sm:$0xff]  ;;  %v563_v53 = vld [vmem:[%s1111_s9 + $0x50] sm:$0xff] }
  0x3c   :  { %711 = vmatprep.subr.mxu0 %v898_v0  ;;  %722 = vmatprep.subr.mxu1 %v898_v0  ;;  %v664_v42 = vld [vmem:[#allocation5] ss:$0 sm:$0xff]  ;;  %v411_v54 = vld [vmem:[%s1111_s9 + $0x8] sm:$0xff] }
  0x3d   :  { %712 = vmatpush3.msra.mxu0 %v89_v4  ;;  %723 = vmatpush3.msra.mxu1 %v217_v9  ;;  %v562_v55 = vld [vmem:[%s1111_s9 + $0x48] sm:$0xff]  ;;  %v410_v56 = vld [vmem:[%s1111_s9] sm:$0xff] }
  0x3e   :  { %714 = vmatmul.mubr.msk.f32.vlgmr.msra.gmra.mxu0 %vm100_vm1, %v984_v5  ;;  %727 = vmatprep.subr.mxu0 %v898_v0  ;;  %v561_v57 = vld [vmem:[%s1111_s9 + $0x40] sm:$0xff] }
  0x3f   :  { %735 = vmatprep.mubr.msk.f32.mxu0 %vm899_vm0, %v898_v0  ;;  %738 = vmatprep.subr.mxu1 %v898_v0  ;;  %v668_v59 = vld [vmem:[%s1108_s6] ss:$0 sm:$0xff] }
  0x40   :  { %725 = vmatmul.mubr.msk.f32.vlgmr.msra.gmra.mxu1 %vm100_vm1, %v984_v5  ;;  %728 = vmatpush3.msra.mxu0 %v216_v10 }
  0x41   :  { %739 = vmatpush3.msra.mxu1 %v417_v11  ;;  %729 = vmatprep.subr.mxu0 %v898_v0 }
  0x42   :  { %740 = vmatprep.subr.mxu1 %v898_v0  ;;  %730 = vmatpush3.msra.mxu0 %v215_v12 }
  0x43   :  { %741 = vmatpush3.msra.mxu1 %v416_v13  ;;  %731 = vmatprep.subr.mxu0 %v898_v0 }
  0x44   :  { %742 = vmatprep.subr.mxu1 %v898_v0  ;;  %732 = vmatpush3.msra.mxu0 %v214_v14 }
  0x45   :  { %743 = vmatpush3.msra.mxu1 %v415_v15  ;;  %733 = vmatprep.subr.mxu0 %v898_v0 }
  0x46   :  { %744 = vmatprep.subr.mxu1 %v898_v0  ;;  %734 = vmatpush3.msra.mxu0 %v213_v16 }
  0x47   :  { %745 = vmatpush3.msra.mxu1 %v414_v17  ;;  %746 = vmatprep.mubr.msk.f32.mxu1 %vm899_vm0, %v898_v0 }
  0x48   :  { %749 = vmatprep.subr.mxu0 %v898_v0  ;;  %760 = vmatprep.subr.mxu1 %v898_v0 }
  0xfe   :  { %v170_v19 = vpop.f32.mrf.mxu0 }
  0xff   :  { %v171_v20 = vadd.f32 %v662_v18, %v170_v19 }
 0x100   :  { %v715_v21 = vpop.f32.mrf.mxu0  ;;  %v287_v48 = vpop.f32.mrf.mxu1 }
 0x101   :  { %v174_v22 = vsel %vm100_vm1, %v171_v20, 0.0  ;;  %v669_v21 = vld [vmem:[%s1109_s7] ss:$0 sm:$0xff]  ;;  %s864_s7 = scalar_lea.vmem %s652_s20, 128 }
 0x102   :  { %v175_v23 = vrot.slane %v174_v22, 4  ;;  %v726_v49 = vpop.f32.mrf.mxu1  ;;  %p865_p6 = scmp.ne.s32.totalorder %s652_s20, %s864_s7  ;;  %p870_p8 = scmp.lt.s32.totalorder %s864_s7, %s864_s7 }
 0x104   :  { %v176_v24 = vadd.f32 %v175_v23, %v174_v22  ;;  %v670_v23 = vld [vmem:[%s1110_s8] ss:$0 sm:$0xff]  ;;  %p871_p9 = por %p870_p8, %p869_p7 }
 0x106   :  { %v177_v25 = vrot.slane %v176_v24, 2  ;;  %p872_p10 = pnand %p871_p9, %p865_p6 }
 0x108   :  { %v178_v26 = vadd.f32 %v177_v25, %v176_v24 }
 0x10a   :  { %v179_v27 = vrot.slane %v178_v26, 1 }
 0x10c   :  { %v180_v28 = vadd.f32 %v179_v27, %v178_v26 }
 0x10e   :  { %v182_v29 = vmul.f32 0.125, %v180_v28 }
 0x110   :  { %v183_v30 = vsub.f32 %v171_v20, %v182_v29 }
 0x112   :  { %v184_v31 = vmul.f32 %v183_v30, %v183_v30 }
 0x114   :  { %v185_v32 = vsel %vm100_vm1, %v184_v31, 0.0  ;;  %v674_v31 = vld [vmem:[#allocation8] ss:$0 sm:$0xff] }
 0x115   :  { %v186_v33 = vrot.slane %v185_v32, 4 }
 0x117   :  { %v187_v34 = vadd.f32 %v186_v33, %v185_v32 }
 0x119   :  { %v188_v35 = vrot.slane %v187_v34, 2 }
 0x11b   :  { %v189_v36 = vadd.f32 %v188_v35, %v187_v34 }
 0x11d   :  { %v190_v37 = vrot.slane %v189_v36, 1 }
 0x11f   :  { %v191_v38 = vadd.f32 %v190_v37, %v189_v36 }
 0x121   :  { %v192_v39 = vmul.f32 0.125, %v191_v38 }
 0x123   :  { %v194_v40 = vadd.f32 1e-05, %v192_v39 }
 0x125   :  { %780 = vrsqrt.f32 %v194_v40 }
 0x132   :  { %v781_v41 = vpop.eup %780 }
 0x133   :  { %v196_v43 = vmul.f32 %v781_v41, %v183_v30 }
 0x135   :  { %v203_v45 = vmul.f32 %v664_v42, %v196_v43 }
 0x137   :  { %v211_v46 = vadd.f32 %v665_v44, %v203_v45 }
 0x139   :  { %v212_v47 = vmax.f32 %v211_v46, 0.0 }
 0x13b   :  { %736 = vmatmul.mubr.msk.f32.vlgmr.msra.gmra.mxu0 %vm100_vm1, %v212_v47  ;;  %747 = vmatmul.mubr.msk.f32.vlgmr.msra.gmra.mxu1 %vm100_vm1, %v212_v47 }
 0x13c   :  { %757 = vmatprep.mubr.msk.f32.mxu0 %vm899_vm0, %v898_v0  ;;  %768 = vmatprep.mubr.msk.f32.mxu1 %vm899_vm0, %v898_v0 }
 0x13d   :  { %750 = vmatpush3.msra.mxu0 %v413_v50  ;;  %761 = vmatpush3.msra.mxu1 %v564_v51 }
 0x13e   :  { %751 = vmatprep.subr.mxu0 %v898_v0  ;;  %762 = vmatprep.subr.mxu1 %v898_v0 }
 0x13f   :  { %752 = vmatpush3.msra.mxu0 %v412_v52  ;;  %763 = vmatpush3.msra.mxu1 %v563_v53 }
 0x140   :  { %753 = vmatprep.subr.mxu0 %v898_v0  ;;  %764 = vmatprep.subr.mxu1 %v898_v0 }
 0x141   :  { %754 = vmatpush3.msra.mxu0 %v411_v54  ;;  %765 = vmatpush3.msra.mxu1 %v562_v55 }
 0x142   :  { %755 = vmatprep.subr.mxu0 %v898_v0  ;;  %766 = vmatprep.subr.mxu1 %v898_v0 }
 0x143   :  { %756 = vmatpush3.msra.mxu0 %v410_v56  ;;  %767 = vmatpush3.msra.mxu1 %v561_v57 }
 0x144   :  { %769 = vmatmul.mubr.msk.f32.vlgmr.msra.gmra.mxu1 %vm100_vm1, %v984_v5 }
 0x1fb   :  { %v360_v58 = vpop.f32.mrf.mxu0  ;;  %v484_v60 = vpop.f32.mrf.mxu1 }
 0x1fc   :  { %v361_v61 = vadd.f32 %v360_v58, %v287_v48 }
 0x1fd   :  { %v737_v62 = vpop.f32.mrf.mxu0  ;;  %v748_v63 = vpop.f32.mrf.mxu1 }
 0x1fe   :  { %v371_v0 = vadd.f32 %v668_v59, %v361_v61 }
 0x200   :  { %v372_v1 = vsel %vm100_vm1, %v371_v0, 0.0 }
 0x201   :  { %v373_v2 = vrot.slane %v372_v1, 4 }
 0x203   :  { %v374_v3 = vadd.f32 %v373_v2, %v372_v1 }
 0x204   :  { %v631_v27 = vpop.f32.mrf.mxu1 }
 0x205   :  { %v375_v4 = vrot.slane %v374_v3, 2 }
 0x206   :  { %v770_v28 = vpop.f32.mrf.mxu1 }
 0x207   :  { %v376_v6 = vadd.f32 %v375_v4, %v374_v3 }
 0x209   :  { %v377_v7 = vrot.slane %v376_v6, 1 }
 0x20b   :  { %v378_v8 = vadd.f32 %v377_v7, %v376_v6 }
 0x20d   :  { %v379_v9 = vmul.f32 0.125, %v378_v8 }
 0x20f   :  { %v380_v5 = vsub.f32 %v371_v0, %v379_v9 }
 0x211   :  { %v381_v10 = vmul.f32 %v380_v5, %v380_v5 }
 0x213   :  { %v382_v11 = vsel %vm100_vm1, %v381_v10, 0.0 }
 0x214   :  { %v383_v12 = vrot.slane %v382_v11, 4 }
 0x216   :  { %v384_v13 = vadd.f32 %v383_v12, %v382_v11 }
 0x218   :  { %v385_v14 = vrot.slane %v384_v13, 2 }
 0x21a   :  { %v386_v15 = vadd.f32 %v385_v14, %v384_v13 }
 0x21c   :  { %v387_v16 = vrot.slane %v386_v15, 1 }
 0x21e   :  { %v388_v17 = vadd.f32 %v387_v16, %v386_v15 }
 0x220   :  { %v389_v18 = vmul.f32 0.125, %v388_v17 }
 0x222   :  { %v391_v19 = vadd.f32 1e-05, %v389_v18 }
 0x224   :  { %782 = vrsqrt.f32 %v391_v19 }
 0x231   :  { %v783_v20 = vpop.eup %782 }
 0x232   :  { %v393_v22 = vmul.f32 %v783_v20, %v380_v5 }
 0x234   :  { %v400_v24 = vmul.f32 %v669_v21, %v393_v22 }
 0x236   :  { %v408_v25 = vadd.f32 %v670_v23, %v400_v24 }
 0x238   :  { %v409_v26 = vmax.f32 %v408_v25, 0.0 }
 0x23a   :  { %758 = vmatmul.mubr.msk.f32.vlgmr.msra.gmra.mxu0 %vm100_vm1, %v409_v26 }
 0x2fa   :  { %v557_v29 = vpop.f32.mrf.mxu0 }
 0x2fb   :  { %v558_v30 = vadd.f32 %v557_v29, %v484_v60 }
 0x2fc   :  { %v759_v32 = vpop.f32.mrf.mxu0 }
 0x2fd   :  { %v635_v33 = vadd.f32 %v631_v27, %v558_v30 }
 0x2ff   :  { %v643_v34 = vadd.f32 %v674_v31, %v635_v33 }
 0x301   :  { %644 = vst [vmem:[#allocation10] sm:$0xff] %v643_v34 }
 0x302   :  { %875 = shalt.err (!%p872_p10)
}
 0x303   :  { %654 = dma.vmem_to_hbm [thread:$0]  %s652_s20, 128, %s1113_s11, [#allocation4]  }
 0x304   :  { %890 = dma.done.wait [#allocation4], 128  }
 0x305   :  { %891 = vsyncadd [#allocation4], 4294967168 }
 0x306   :  { %658 = vsyncpa [#allocation3], 1 }
 0x307   :  { %659 = vsyncpa [#allocation6], 1 }
 0x308   :  { %660 = vsyncpa [#allocation9], 1 }
 0x309   :  { %661 = vsyncpa [#allocation4], 1 }

</bundles_post_ra>
